<compile_context>
chip_gen: v5e
topology: v5e:2x2
jax: 0.10.0
libtpu: 0.0.40
codegen_flags: <defaults>
</compile_context>

<pallas_src>
import math

import jax
import jax.numpy as jnp
from jax.experimental import pallas as pl
from jax.experimental.pallas import tpu as pltpu


# ----------------------------------------------------------------------------- helpers


def _row_tile(n, target=512):
    """Largest tile <= target that divides n and is a multiple of 8 (else n)."""
    if n <= target:
        return n
    t = (target // 8) * 8
    while t >= 8:
        if n % t == 0:
            return t
        t -= 8
    return n


def build_pe(d_model, max_seq_len, dtype=jnp.float32):
    """Sinusoidal table, identical to PositionalEncoding.__init__."""
    position = jnp.arange(max_seq_len, dtype=jnp.float32)[:, None]
    div_term = jnp.exp(
        jnp.arange(0, d_model, 2, dtype=jnp.float32) * (-math.log(10000.0) / d_model))
    ang = position * div_term
    pe = jnp.zeros((max_seq_len, d_model), jnp.float32)
    pe = pe.at[:, 0::2].set(jnp.sin(ang))
    pe = pe.at[:, 1::2].set(jnp.cos(ang))
    return pe.astype(dtype)


def build_step_table(T, d_model, dtype=jnp.float32):
    """Sin/cos interleaved table, identical to StepEmbedding.__init__."""
    emb = jnp.arange(0, d_model, 2, dtype=jnp.float32) / d_model * math.log(10000.0)
    emb = jnp.exp(-emb)                                   # (d_model/2,)
    pos = jnp.arange(T, dtype=jnp.float32)
    ang = pos[:, None] * emb[None, :]                     # (T, d_model/2)
    tab = jnp.stack([jnp.sin(ang), jnp.cos(ang)], axis=-1).reshape(T, d_model)
    return tab.astype(dtype)


# ----------------------------------------------------------------------------- kernels


def combine_pe(x_t, x_ob, step_emb, pe_slice):
    """Fused (x_ob + x_t) * step_emb + pe  (PositionalEncoding add, eval mode).

    # TODO(synk): training-mode dropout (p=0.1) not implemented; the demo module
    # runs in eval mode where dropout is the identity.
    """
    B, S, D = x_t.shape
    ts = _row_tile(S)
    n_s = S // ts
    se3 = step_emb.reshape(B, 1, D)

    def kernel(xt_ref, xo_ref, st_ref, pe_ref, o_ref):
        y = xo_ref[...].astype(jnp.float32) + xt_ref[...].astype(jnp.float32)
        y = y * st_ref[...].astype(jnp.float32) + pe_ref[...].astype(jnp.float32)
        o_ref[...] = y.astype(o_ref.dtype)

    return pl.pallas_call(
        kernel,
        out_shape=jax.ShapeDtypeStruct((B, S, D), x_t.dtype),
        grid=(B, n_s),
        in_specs=[
            pl.BlockSpec((None, ts, D), lambda b, s: (b, s, 0)),   # x_t
            pl.BlockSpec((None, ts, D), lambda b, s: (b, s, 0)),   # x_ob
            pl.BlockSpec((None, 1, D), lambda b, s: (b, 0, 0)),    # step embedding
            pl.BlockSpec((ts, D), lambda b, s: (s, 0)),            # pe
        ],
        out_specs=pl.BlockSpec((None, ts, D), lambda b, s: (b, s, 0)),
        compiler_params=pltpu.CompilerParams(
            dimension_semantics=("parallel", "parallel")),
    )(x_t, x_ob, se3, pe_slice)


def encoder_layer(x, lyr, *, n_head, eps=1e-5):
    """One post-norm nn.TransformerEncoderLayer, fully fused in a single pallas_call.

    Per grid step (one batch element): qkv = x @ Wqkv + b; per-head
    softmax((q/sqrt(hd)) k^T) v; out-proj accumulated per head (no concat/transpose);
    LayerNorm(x + attn); ReLU FFN; LayerNorm(x + ffn).  Matmul inputs bf16,
    accumulation f32, softmax/LN math f32.

    # TODO(synk): whole-S attention per batch element; a flash-style kv tiling would
    # be needed for very long sequences (VMEM headroom shrinks first on v7x).
    """
    B, S, D = x.shape
    H = n_head
    hd = D // H
    FF = lyr["w1_t"].shape[1]
    scale = 1.0 / math.sqrt(hd)

    def kernel(x_ref, wqkv_ref, bqkv_ref, wo_ref, bo_ref, g1_ref, beta1_ref,
               w1_ref, b1_ref, w2_ref, b2_ref, g2_ref, beta2_ref, o_ref):
        x0 = x_ref[...].astype(jnp.float32)                                # [S, D]

        # ---- self-attention -------------------------------------------------
        qkv = jnp.dot(x0.astype(jnp.bfloat16), wqkv_ref[...],
                      preferred_element_type=jnp.float32)
        qkv = qkv + bqkv_ref[...].astype(jnp.float32)                      # [S, 3D]

        proj = None
        for h in range(H):                                                  # static loop, H=4
            q = (qkv[:, h * hd:(h + 1) * hd] * scale).astype(jnp.bfloat16)
            k = qkv[:, D + h * hd:D + (h + 1) * hd].astype(jnp.bfloat16)
            v = qkv[:, 2 * D + h * hd:2 * D + (h + 1) * hd].astype(jnp.bfloat16)
            s = jax.lax.dot_general(q, k, (((1,), (1,)), ((), ())),
                                    preferred_element_type=jnp.float32)    # [S, S]
            m = jnp.max(s, axis=-1, keepdims=True)
            p = jnp.exp(s - m)
            denom = jnp.sum(p, axis=-1, keepdims=True)
            o_h = jnp.dot(p.astype(jnp.bfloat16), v,
                          preferred_element_type=jnp.float32)               # [S, hd]
            o_h = o_h * pl.reciprocal(denom, approx=True)
            # concat(heads) @ Wo == sum_h o_h @ Wo[h*hd:(h+1)*hd, :]
            c = jnp.dot(o_h.astype(jnp.bfloat16), wo_ref[h * hd:(h + 1) * hd, :],
                        preferred_element_type=jnp.float32)                 # [S, D]
            proj = c if proj is None else proj + c
        proj = proj + bo_ref[...].astype(jnp.float32)

        # ---- add & LayerNorm 1 ----------------------------------------------
        y = x0 + proj
        mu = jnp.mean(y, axis=-1, keepdims=True)
        yc = y - mu
        var = jnp.mean(yc * yc, axis=-1, keepdims=True)
        y = yc * jax.lax.rsqrt(var + eps) * g1_ref[...].astype(jnp.float32) \
            + beta1_ref[...].astype(jnp.float32)

        # ---- FFN + add & LayerNorm 2 ------------------------------------------
        hid = jnp.dot(y.astype(jnp.bfloat16), w1_ref[...],
                      preferred_element_type=jnp.float32) + b1_ref[...].astype(jnp.float32)
        hid = jnp.maximum(hid, 0.0)
        f = jnp.dot(hid.astype(jnp.bfloat16), w2_ref[...],
                    preferred_element_type=jnp.float32) + b2_ref[...].astype(jnp.float32)
        z = y + f
        mu2 = jnp.mean(z, axis=-1, keepdims=True)
        zc = z - mu2
        var2 = jnp.mean(zc * zc, axis=-1, keepdims=True)
        z = zc * jax.lax.rsqrt(var2 + eps) * g2_ref[...].astype(jnp.float32) \
            + beta2_ref[...].astype(jnp.float32)

        o_ref[...] = z.astype(o_ref.dtype)

    full = lambda b: (0, 0)
    return pl.pallas_call(
        kernel,
        out_shape=jax.ShapeDtypeStruct((B, S, D), x.dtype),
        grid=(B,),
        in_specs=[
            pl.BlockSpec((None, S, D), lambda b: (b, 0, 0)),   # x
            pl.BlockSpec((D, 3 * D), full),                    # wqkv_t (bf16)
            pl.BlockSpec((1, 3 * D), full),                    # bqkv
            pl.BlockSpec((D, D), full),                        # wo_t   (bf16)
            pl.BlockSpec((1, D), full),                        # bo
            pl.BlockSpec((1, D), full),                        # ln1 gamma
            pl.BlockSpec((1, D), full),                        # ln1 beta
            pl.BlockSpec((D, FF), full),                       # w1_t   (bf16)
            pl.BlockSpec((1, FF), full),                       # b1
            pl.BlockSpec((FF, D), full),                       # w2_t   (bf16)
            pl.BlockSpec((1, D), full),                        # b2
            pl.BlockSpec((1, D), full),                        # ln2 gamma
            pl.BlockSpec((1, D), full),                        # ln2 beta
        ],
        out_specs=pl.BlockSpec((None, S, D), lambda b: (b, 0, 0)),
        compiler_params=pltpu.CompilerParams(
            dimension_semantics=("parallel",)),
    )(x, lyr["wqkv_t"], lyr["bqkv"], lyr["wo_t"], lyr["bo"],
      lyr["ln1_g"], lyr["ln1_b"], lyr["w1_t"], lyr["b1"],
      lyr["w2_t"], lyr["b2"], lyr["ln2_g"], lyr["ln2_b"])


# ----------------------------------------------------------------------------- model


def init_params(key, T, max_seq_len, d_model=128, n_head=4, num_layers=4, ffn_dim=2048):
    D = 2 * d_model
    HI = jax.lax.Precision.HIGHEST

    def xavier(k, fan_in, fan_out, dtype=jnp.float32):
        lim = math.sqrt(6.0 / (fan_in + fan_out))
        w = jax.random.uniform(k, (fan_in, fan_out), jnp.float32, -lim, lim)
        return w.astype(dtype)

    keys = iter(jax.random.split(key, 2 + 4 * num_layers))

    # StepEmbedding: frozen sin/cos table -> Linear -> Swish -> Linear.  The MLP is
    # deterministic given the frozen table, so precompute all T outputs once (a
    # [T, D] table); the forward only gathers rows — no dedicated kernel needed.
    step_table = build_step_table(T, D)
    sw1 = xavier(next(keys), D, D)
    sb1 = jnp.zeros((1, D), jnp.float32)
    sw2 = xavier(next(keys), D, D)
    sb2 = jnp.zeros((1, D), jnp.float32)
    h = jnp.dot(step_table, sw1, precision=HI) + sb1
    h = h * (1.0 / (1.0 + jnp.exp(-h)))                                 # Swish
    step_out_table = jnp.dot(h, sw2, precision=HI) + sb2               # [T, D]

    params = {
        "n_head": n_head,
        "pe": build_pe(D, max_seq_len),
        "step_table": step_table,
        "step_w1_t": sw1, "step_b1": sb1, "step_w2_t": sw2, "step_b2": sb2,
        "step_out_table": step_out_table,
        "layers": [],
    }
    for _ in range(num_layers):
        params["layers"].append({
            # MXU operands stored bf16 (kernels accumulate in f32).
            "wqkv_t": xavier(next(keys), D, 3 * D, jnp.bfloat16),
            "bqkv": jnp.zeros((1, 3 * D), jnp.float32),
            "wo_t": xavier(next(keys), D, D, jnp.bfloat16),
            "bo": jnp.zeros((1, D), jnp.float32),
            "ln1_g": jnp.ones((1, D), jnp.float32),
            "ln1_b": jnp.zeros((1, D), jnp.float32),
            "w1_t": xavier(next(keys), D, ffn_dim, jnp.bfloat16),
            "b1": jnp.zeros((1, ffn_dim), jnp.float32),
            "w2_t": xavier(next(keys), ffn_dim, D, jnp.bfloat16),
            "b2": jnp.zeros((1, D), jnp.float32),
            "ln2_g": jnp.ones((1, D), jnp.float32),
            "ln2_b": jnp.zeros((1, D), jnp.float32),
        })
    return params


def transformer_layer_forward(params, x_t, x_ob, t):
    """Pallas forward.  x_t, x_ob: [B, S, D]; t: [B] int32.  5 pallas_calls total."""
    B, S, D = x_t.shape
    se = params["step_out_table"][t]                    # tiny XLA gather, [B, D]
    x = combine_pe(x_t, x_ob, se, params["pe"][:S])
    for lyr in params["layers"]:
        x = encoder_layer(x, lyr, n_head=params["n_head"])
    return x


# ----------------------------------------------------------------------------- pure-JAX reference


def _ref_layernorm(x, g, b, eps=1e-5):
    mu = jnp.mean(x, axis=-1, keepdims=True)
    xc = x - mu
    var = jnp.mean(xc * xc, axis=-1, keepdims=True)
    return xc * jax.lax.rsqrt(var + eps) * g + b


def transformer_layer_ref(params, x_t, x_ob, t):
    HI = jax.lax.Precision.HIGHEST
    B, S, D = x_t.shape
    H = params["n_head"]
    hd = D // H

    emb = params["step_table"][t]
    h = jnp.dot(emb, params["step_w1_t"], precision=HI) + params["step_b1"]
    h = h * (1.0 / (1.0 + jnp.exp(-h)))
    se = jnp.dot(h, params["step_w2_t"], precision=HI) + params["step_b2"]

    x = (x_ob + x_t) * se[:, None, :] + params["pe"][None, :S, :]

    x2 = x.reshape(B * S, D)
    for lyr in params["layers"]:
        wqkv = lyr["wqkv_t"].astype(jnp.float32)
        wo = lyr["wo_t"].astype(jnp.float32)
        w1 = lyr["w1_t"].astype(jnp.float32)
        w2 = lyr["w2_t"].astype(jnp.float32)
        qkv = jnp.dot(x2, wqkv, precision=HI) + lyr["bqkv"]
        qkv4 = qkv.reshape(B, S, 3, H, hd)
        q = jnp.transpose(qkv4[:, :, 0], (0, 2, 1, 3))
        k = jnp.transpose(qkv4[:, :, 1], (0, 2, 1, 3))
        v = jnp.transpose(qkv4[:, :, 2], (0, 2, 1, 3))
        s = jnp.einsum("bhqd,bhkd->bhqk", q, k, precision=HI) / math.sqrt(hd)
        s = s - jnp.max(s, axis=-1, keepdims=True)
        p = jnp.exp(s)
        p = p / jnp.sum(p, axis=-1, keepdims=True)
        a = jnp.einsum("bhqk,bhkd->bhqd", p, v, precision=HI)
        a2 = jnp.transpose(a, (0, 2, 1, 3)).reshape(B * S, D)
        a2 = jnp.dot(a2, wo, precision=HI) + lyr["bo"]
        x2 = _ref_layernorm(x2 + a2, lyr["ln1_g"], lyr["ln1_b"])
        hh = jnp.maximum(jnp.dot(x2, w1, precision=HI) + lyr["b1"], 0.0)
        ff = jnp.dot(hh, w2, precision=HI) + lyr["b2"]
        x2 = _ref_layernorm(x2 + ff, lyr["ln2_g"], lyr["ln2_b"])
    return x2.reshape(B, S, D)


# ----------------------------------------------------------------------------- demo


if __name__ == "__main__":
    # Module defaults: d_model=128 -> D=256, 4 heads, 4 encoder layers, T=10 steps,
    # max_seq_len=16, batch=2, seq=8.
    T, max_seq_len = 10, 16
    d_model, n_head, num_layers = 128, 4, 4
    D = 2 * d_model
    B, S = 2, 8

    root = jax.random.PRNGKey(0)
    kp, kx, ko, kt = jax.random.split(root, 4)

    params = init_params(kp, T, max_seq_len, d_model, n_head, num_layers)
    x_t = jax.random.normal(kx, (B, S, D), jnp.float32)
    x_ob = jax.random.normal(ko, (B, S, D), jnp.float32)
    t = jax.random.randint(kt, (B,), 0, T)

    out = transformer_layer_forward(params, x_t, x_ob, t)
    out = jax.block_until_ready(out)

    ref = transformer_layer_ref(params, x_t, x_ob, t)
    assert out.shape == (B, S, D) and out.dtype == x_t.dtype
    max_diff = float(jnp.max(jnp.abs(out - ref)))
    assert jnp.allclose(out, ref, atol=2e-2, rtol=2e-2), f"mismatch vs reference, max={max_diff}"

    print("KERNEL_OK")
</pallas_src>

<mosaic_0001>
module attributes {stable_mosaic.version = 11 : i64} {
  func.func @kernel(%arg0: i32, %arg1: i32, %arg2: memref<1x8x256xf32, #tpu.memory_space<vmem>>, %arg3: memref<1x8x256xf32, #tpu.memory_space<vmem>>, %arg4: memref<1x1x256xf32, #tpu.memory_space<vmem>>, %arg5: memref<8x256xf32, #tpu.memory_space<vmem>>, %arg6: memref<1x8x256xf32, #tpu.memory_space<vmem>>) attributes {dimension_semantics = [#tpu.dimension_semantics<parallel>, #tpu.dimension_semantics<parallel>], iteration_bounds = array<i64: 2, 1>, scalar_prefetch = 0 : i64, scratch_operands = 0 : i64, tpu.core_type = #tpu.core_type<tc>, window_params = [{transform_indices = @transform_0, window_bounds = array<i64: 1, 8, 256>}, {transform_indices = @transform_1, window_bounds = array<i64: 1, 8, 256>}, {transform_indices = @transform_2, window_bounds = array<i64: 1, 1, 256>}, {transform_indices = @transform_3, window_bounds = array<i64: 8, 256>}, {transform_indices = @transform_4, window_bounds = array<i64: 1, 8, 256>}]} {
    %c0 = arith.constant 0 : index
    %c0_0 = arith.constant 0 : index
    %c0_1 = arith.constant 0 : index
    %0 = vector.load %arg3[%c0, %c0_0, %c0_1] : memref<1x8x256xf32, #tpu.memory_space<vmem>>, vector<1x8x256xf32>
    %1 = vector.shape_cast %0 : vector<1x8x256xf32> to vector<8x256xf32>
    %c0_2 = arith.constant 0 : index
    %c0_3 = arith.constant 0 : index
    %c0_4 = arith.constant 0 : index
    %2 = vector.load %arg2[%c0_2, %c0_3, %c0_4] : memref<1x8x256xf32, #tpu.memory_space<vmem>>, vector<1x8x256xf32>
    %3 = vector.shape_cast %2 : vector<1x8x256xf32> to vector<8x256xf32>
    %4 = arith.addf %1, %3 : vector<8x256xf32>
    %c0_5 = arith.constant 0 : index
    %c0_6 = arith.constant 0 : index
    %c0_7 = arith.constant 0 : index
    %5 = vector.load %arg4[%c0_5, %c0_6, %c0_7] : memref<1x1x256xf32, #tpu.memory_space<vmem>>, vector<1x1x256xf32>
    %6 = vector.shape_cast %5 : vector<1x1x256xf32> to vector<1x256xf32>
    %7 = vector.broadcast %6 : vector<1x256xf32> to vector<8x256xf32>
    %8 = arith.mulf %4, %7 : vector<8x256xf32>
    %c0_8 = arith.constant 0 : index
    %c0_9 = arith.constant 0 : index
    %9 = vector.load %arg5[%c0_8, %c0_9] : memref<8x256xf32, #tpu.memory_space<vmem>>, vector<8x256xf32>
    %10 = arith.addf %8, %9 : vector<8x256xf32>
    %c0_10 = arith.constant 0 : index
    %c0_11 = arith.constant 0 : index
    %c0_12 = arith.constant 0 : index
    %11 = vector.load %arg6[%c0_10, %c0_11, %c0_12] : memref<1x8x256xf32, #tpu.memory_space<vmem>>, vector<1x8x256xf32>
    %12 = vector.shape_cast %11 : vector<1x8x256xf32> to vector<8x256xf32>
    %13 = vector.shape_cast %10 : vector<8x256xf32> to vector<1x8x256xf32>
    tpu.vector_store %arg6[%c0_10, %c0_11, %c0_12], %13 {strides = array<i32>} : memref<1x8x256xf32, #tpu.memory_space<vmem>>, vector<1x8x256xf32>,
    return
  }
  func.func @transform_0(%arg0: i32, %arg1: i32) -> (i32, i32, i32) {
    %c0_i32 = arith.constant 0 : i32
    %c0_i32_0 = arith.constant 0 : i32
    return %arg0, %arg1, %c0_i32 : i32, i32, i32
  }
  func.func @transform_1(%arg0: i32, %arg1: i32) -> (i32, i32, i32) {
    %c0_i32 = arith.constant 0 : i32
    %c0_i32_0 = arith.constant 0 : i32
    return %arg0, %arg1, %c0_i32 : i32, i32, i32
  }
  func.func @transform_2(%arg0: i32, %arg1: i32) -> (i32, i32, i32) {
    %c0_i32 = arith.constant 0 : i32
    %c0_i32_0 = arith.constant 0 : i32
    %c0_i32_1 = arith.constant 0 : i32
    return %arg0, %c0_i32, %c0_i32_0 : i32, i32, i32
  }
  func.func @transform_3(%arg0: i32, %arg1: i32) -> (i32, i32) {
    %c0_i32 = arith.constant 0 : i32
    %c0_i32_0 = arith.constant 0 : i32
    return %arg1, %c0_i32 : i32, i32
  }
  func.func @transform_4(%arg0: i32, %arg1: i32) -> (i32, i32, i32) {
    %c0_i32 = arith.constant 0 : i32
    %c0_i32_0 = arith.constant 0 : i32
    return %arg0, %arg1, %c0_i32 : i32, i32, i32
  }
}

</mosaic_0001>

<bundles_post_ra>
// kernel: tpu_custom_call.1
= control target key start
LH: loop header
LB: loop body
LE: loop exit
PB: predicated region body
PF: predicated region fallthrough
CT: control target
= control target key end

     0   :  { %s1050_s0 = inlined_call_operand.hbm [shape: f32[2,8,256], index: 0, kind: input, shape index: {}]   ;;  %s1051_s1 = inlined_call_operand.hbm [shape: f32[2,8,256], index: 1, kind: input, shape index: {}]   ;;  %s1052_s2 = inlined_call_operand.hbm [shape: f32[2,1,256], index: 2, kind: input, shape index: {}]   ;;  %s1053_s3 = inlined_call_operand.hbm [shape: f32[8,256], index: 3, kind: input, shape index: {}]   ;;  %s1054_s4 = inlined_call_operand.hbm [shape: f32[2,8,256], index: 4, kind: output, shape index: {}]  }
   0x1   :  { %1059 = sst [smem:[#allocation19_spill]] %s1051_s1 }
   0x2   :  { %1060 = sst [smem:[#allocation20_spill]] %s1053_s3 }
   0x3   :  { %9 = vsyncpa [#allocation3], 0 }
   0x4   :  { %11 = vsyncpa [#allocation3 + $0x1], 0 }
   0x5   :  { %12 = vsyncpa [#allocation6], 0 }
   0x6   :  { %14 = vsyncpa [#allocation6 + $0x1], 0 }
   0x7   :  { %15 = vsyncpa [#allocation9], 0 }
   0x8   :  { %16 = vsyncpa [#allocation4], 0 }
   0x9   :  { %18 = vsyncpa [#allocation4 + $0x1], 0  ;;  %s866_s15 = smov 0   ;;  %s868_s16 = smov 0  }
   0xa   :  { %s870_s17 = smov 0   ;;  %s872_s18 = smov 0  }
   0xb   :  { %s874_s19 = smov 0   ;;  %s876_s20 = smov 0  }
   0xc LB: > { %1061 = sst [smem:[#allocation15_spill]] %s826_s17  ;;  %s36_s21 = sadd.s32 1, %s834_s19  ;;  %s838_s20 = sphi %s876_s20, %s24_s20   ;;  %s834_s19 = sphi %s874_s19, %s1079_s19   ;;  %s830_s18 = sphi %s872_s18, %s1078_s18   ;;  %s826_s17 = sphi %s870_s17, %s1074_s17   ;;  %s822_s16 = sphi %s868_s16, %s1077_s16   ;;  %s818_s15 = sphi %s866_s15, %s1076_s15  }
   0xd   : > { %1062 = sst [smem:[#allocation16_spill]] %s838_s20  ;;  %s45_s22 = sadd.s32 1, %s826_s17 }
   0xe   : > { %p38_p0 = scmp.ge.s32.totalorder %s36_s21, 2  ;;  %p52_p1 = scmp.ne.s32.totalorder %s826_s17, %s822_s16 }
   0xf   : > { %p53_p2 = scmp.eq.s32.totalorder %s838_s20, 0  ;;  %p522_p3 = scmp.ge.s32.totalorder %s838_s20, 2 }
  0x10   : > { %s1081_s21 = smov (%p38_p0, %s36_s21), 0  ;;  %p576_p5 = scmp.lt.s32.totalorder %s838_s20, 2 }
  0x11   : > { %1063 = sst [smem:[#allocation17_spill]] %s1081_s21  ;;  %p54_p4 = por %p53_p2, %p52_p1 }
  0x12   : > { %s40_s23 = ssub.s32 %s834_s19, %s1081_s21  ;;  %s911_s24 = sand.u32 1, %s826_s17  }
  0x13   : > { %p43_p6 = scmp.eq.s32.totalorder %s40_s23, 0  ;;  %s523_s25 = sshll.u32 %s911_s24, 4 }
  0x14   : > { %s542_s26 = sshll.u32 %s834_s19, 4  ;;  %p915_p7 = pnand %p576_p5, %p54_p4 }
  0x15   : > { %s920_s28 = scalar_select %p43_p6, %s826_s17, %s45_s22  }
  0x16   : > { %s227_s29 = sand.u32 1, %s838_s20   ;;  %s1066_s1 = sld [smem:[#allocation19_spill]] }
  0x17   : > { %1065 = sst [smem:[#allocation18_spill]] %s920_s28  ;;  %s231_s7 = scalar_lea.vmem [#allocation5], %s523_s25 }
  0x18   : > { %s242_s8 = sshll.u32 %s231_s7, 4  ;;  %s930_s10 = scalar_lea.sflag [#allocation6], %s227_s29  ;;  %s243_s8 = int_to_ptr.vmem [resolvable:$true] %s242_s8 }
  0x19   : > { %s936_s11 = sadd.s32 4294967295, %s838_s20   ;;  %s519_s12 = sadd.s32 4294967294, %s838_s20  }
  0x1a   : > { %p58_p8 = scmp.ne.s32.totalorder %s822_s16, %s818_s15  ;;  %p59_p9 = scmp.eq.s32.totalorder %s936_s11, 0 }
  0x1b   : > { %p164_p10 = scmp.eq.s32.totalorder %s936_s11, 1  ;;  %p170_p11 = scmp.eq.s32.totalorder %s519_s12, 1 }
  0x1c   : > { %s238_s6 = scalar_lea.hbm %s1066_s1, %s542_s26  ;;  %p520_p12 = scmp.ge.s32.totalorder %s838_s20, 1 }
  0x1d   : > { %s240_s9 = sshll.u32 %s238_s6, 4  ;;  %p946_p13 = por %p59_p9, %p58_p8  ;;  %s241_s9 = int_to_ptr.hbm [resolvable:$true] %s240_s9 }
  0x1e   : > { %567 = dma.hbm_to_vmem [thread:$0]  (!%p915_p7), %s241_s9, 256, %s243_s8, %s930_s10  }
  0x1f   : > { %p953_p0 = por %p164_p10, %p52_p1  ;;  %p957_p2 = por %p170_p11, %p58_p8 }
  0x20   : > { %p177_p4 = scmp.lt.s32.totalorder %s838_s20, 3  ;;  %s1070_s3 = sld [smem:[#allocation20_spill]] }
  0x21   : > { %s840_s6 = smov [#allocation8]   ;;  %s216_s12 = scalar_lea.hbm %s1050_s0, %s542_s26 }
  0x22   : > { %p965_p5 = pnand %p520_p12, %p177_p4  ;;  %s194_s7 = sshll.u32 %s840_s6, 4  ;;  %s195_s7 = int_to_ptr.vmem [resolvable:$true] %s194_s7 }
  0x23   : > { %s218_s23 = sshll.u32 %s216_s12, 4  ;;  %s209_s29 = scalar_lea.vmem [#allocation2], %s523_s25  ;;  %s219_s23 = int_to_ptr.hbm [resolvable:$true] %s218_s23 }
  0x24   : > { %p557_p1 = pneg %p965_p5  ;;  %s220_s1 = sshll.u32 %s209_s29, 4  ;;  %s221_s1 = int_to_ptr.vmem [resolvable:$true] %s220_s1 }
  0x25   : > { %s206_s21 = scalar_lea.sflag [#allocation3], %s911_s24  ;;  %s530_s6 = sshll.u32 %s834_s19, 1 }
  0x26   : > { %s192_s30 = sshll.u32 %s1070_s3, 4  ;;  %p558_p6 = pnand %p557_p1, %p59_p9  ;;  %s193_s30 = int_to_ptr.hbm [resolvable:$true] %s192_s30 }
  0x27   : > { %s529_s3 = sshll.u32 %s911_s24, 1  ;;  %s257_s20 = scalar_lea.hbm %s1052_s2, %s530_s6 }
  0x28   : > { %560 = dma.hbm_to_vmem [thread:$0]  (!%p558_p6), %s193_s30, 256, %s195_s7, [#allocation9]  }
  0x29   : > { %564 = dma.hbm_to_vmem [thread:$0]  (!%p915_p7), %s219_s23, 256, %s221_s1, %s206_s21  }
  0x2a   : > { %s253_s8 = scalar_lea.vmem [#allocation7], %s529_s3  ;;  %s259_s9 = sshll.u32 %s257_s20, 4  ;;  %s260_s9 = int_to_ptr.hbm [resolvable:$true] %s259_s9 }
  0x2b   : > { %s261_s26 = sshll.u32 %s253_s8, 4  ;;  %270 = sbr.rel (%p965_p5) target bundleno = 70 (0x46), region = 36  ;;  %s262_s26 = int_to_ptr.vmem [resolvable:$true] %s261_s26 }
  0x2c   : > { %570 = dma.hbm_to_vmem [thread:$0]  (!%p915_p7), %s260_s9, 32, %s262_s26, %s930_s10  }
  0x2d   : > { %s994_s24 = sand.u32 (!%p965_p5), 1, %s822_s16  }
  0x2e   : > { %s532_s1 = sshll.u32 (!%p965_p5), %s994_s24, 4  ;;  %s273_s21 = scalar_lea.sflag (!%p965_p5), [#allocation3], %s994_s24 }
  0x2f   : > { %s276_s17 = scalar_lea.vmem (!%p965_p5), [#allocation2], %s532_s1 }
  0x30   : > { %801 = dma.done.wait (%p946_p13), %s273_s21, 256  }
  0x31   : > { %803 = vsyncadd (%p946_p13), %s273_s21, 4294967040  ;;  %s282_s3 = sand.u32 1, %s936_s11   ;;  %s286_s25 = scalar_lea.vmem [#allocation5], %s532_s1 }
  0x32   : > { %s283_s20 = scalar_lea.sflag [#allocation6], %s282_s3 }
  0x33   : > { %805 = dma.done.wait (%p946_p13), %s283_s20, 288  }
  0x34   : > { %807 = vsyncadd (%p946_p13), %s283_s20, 4294967008  ;;  %s534_s27 = sshll.u32 %s994_s24, 1 }
  0x35   : > { %s296_s28 = scalar_lea.vmem [#allocation7], %s534_s27 }
  0x36   : > { %809 = dma.done.wait (%p59_p9), [#allocation9], 256  }
  0x37   : > { %811 = vsyncadd (%p59_p9), [#allocation9], 4294967040  ;;  %s544_s10 = sshll.u32 %s830_s18, 4  ;;  %v337_v0 = vld [vmem:[%s286_s25] sm:$0xff]  ;;  %v338_v5 = vld [vmem:[%s286_s25 + $0x8] sm:$0xff]  ;;  %s336_s11 = scalar_lea.vmem [#allocation10], %s532_s1 }
  0x38   : > { %v339_v1 = vld [vmem:[%s276_s17] sm:$0xff]  ;;  %s371_s7 = scalar_lea.hbm %s1054_s4, %s544_s10  ;;  %v340_v6 = vld [vmem:[%s276_s17 + $0x8] sm:$0xff]  ;;  %s373_s13 = sshll.u32 %s336_s11, 4  ;;  %s374_s13 = int_to_ptr.vmem [resolvable:$true] %s373_s13 }
  0x39   : > { %v343_v2 = vld [vmem:[%s296_s28] sm:$0x3]  ;;  %v341_v3 = vadd.f32 %v339_v1, %v337_v0  ;;  %v351_v8 = vld [vmem:[#allocation8] sm:$0xff]  ;;  %v342_v9 = vadd.f32 %v340_v6, %v338_v5  ;;  %v352_v11 = vld [vmem:[#allocation8 + $0x8] sm:$0xff]  ;;  %s375_s18 = sshll.u32 %s371_s7, 4  ;;  %s358_s12 = scalar_lea.sflag [#allocation4], %s994_s24  ;;  %s376_s18 = int_to_ptr.hbm [resolvable:$true] %s375_s18 }
  0x3a   : > { %v345_v4 = vperm.slane %v343_v2, 0  ;;  %v346_v7 = vperm.slane %v343_v2, 1  ;;  %s762_s23 = sshra.s32 %s376_s18, 4  ;;  %s768_s26 = scalar_lea.hbm %s1054_s4, 32  ;;  %s763_s23 = int_to_ptr.hbm [resolvable:$true] %s762_s23 }
  0x3b   : > { %s764_s29 = scalar_lea.hbm %s763_s23, 16  ;;  %p769_p10 = scmp.lt.s32.totalorder %s763_s23, %s1054_s4 }
  0x3c   : > { %v349_v10 = vmul.f32 %v345_v4, %v341_v3  ;;  %v350_v12 = vmul.f32 %v346_v7, %v342_v9  ;;  %p765_p7 = scmp.ne.s32.totalorder %s763_s23, %s764_s29  ;;  %p770_p11 = scmp.lt.s32.totalorder %s768_s26, %s764_s29 }
  0x3e   : > { %v353_v13 = vadd.f32 %v351_v8, %v349_v10  ;;  %v354_v14 = vadd.f32 %v352_v11, %v350_v12  ;;  %p766_p8 = pnand %p765_p7, %p953_p0  ;;  %p771_p12 = por %p770_p11, %p769_p10 }
  0x40   : > { %355 = vst [vmem:[%s336_s11] sm:$0xff] %v353_v13  ;;  %p767_p9 = pneg %p766_p8 }
  0x41   : > { %356 = vst [vmem:[%s336_s11 + $0x8] sm:$0xff] %v354_v14 }
  0x42   : > { %p772_p13 = pnand %p771_p12, %p767_p9 }
  0x44   : > { %775 = shalt.err (!%p772_p13)
}
  0x45   : > { %555 = dma.vmem_to_hbm [thread:$0]  (%p953_p0), %s374_s13, 256, %s376_s18, %s358_s12  }
  0x46 PF: > { %s1072_s24 = sld [smem:[#allocation16_spill]]  ;;  %s387_s21 = sand.u32 1, %s818_s15  }
  0x47   : > { %p572_p4 = pnand %p522_p3, %p957_p2  ;;  %s388_s17 = scalar_lea.sflag [#allocation4], %s387_s21 }
  0x49   : > { %p573_p5 = pneg %p572_p4 }
  0x4b   : > { %813 = dma.done.wait (%p573_p5), %s388_s17, 256  }
  0x4c   : > { %815 = vsyncadd (%p573_p5), %s388_s17, 4294967040  ;;  %s24_s20 = sadd.s32 1, %s1072_s24   ;;  %s1073_s3 = sld [smem:[#allocation15_spill]] }
  0x4d   : > { %p21_p1 = scmp.ge.s32.totalorder %s24_s20, 4   ;;  %s1074_s17 = sld [smem:[#allocation18_spill]] }
  0x4e   : > { %s1075_s14 = sld [smem:[#allocation17_spill]]  ;;  %s1076_s15 = smov %s822_s16 }
  0x4f   : > { %s1078_s18 = smov %s834_s19 }
  0x50   :  { %23 = sbr.rel (!%p21_p1) target bundleno = 12 (0xc), region = 110 }
  0x52   : > { %s1077_s16 = smov %s1073_s3 }
  0x54   : > { %s1079_s19 = smov %s1075_s14 }
  0x55   :  { %394 = vsyncpa [#allocation3], 1 }
  0x56   :  { %396 = vsyncpa [#allocation3 + $0x1], 1 }
  0x57   :  { %397 = vsyncpa [#allocation6], 1 }
  0x58   :  { %399 = vsyncpa [#allocation6 + $0x1], 1 }
  0x59   :  { %400 = vsyncpa [#allocation9], 1 }
  0x5a   :  { %401 = vsyncpa [#allocation4], 1 }
  0x5b   :  { %403 = vsyncpa [#allocation4 + $0x1], 1 }

</bundles_post_ra>
